<compile_context>
chip_gen: v6e
topology: v6e:2x2x1
jax: 0.10.0
libtpu: 0.0.40
codegen_flags: <defaults>
</compile_context>

<pallas_src>
import functools

import jax
import jax.numpy as jnp
from jax.experimental import pallas as pl
from jax.experimental.pallas import tpu as pltpu

_EPS = 1e-5
_LANE = 128         # lane-count alignment target for the flattened spatial axis
_SUB_BF16 = 16      # bf16 sublane tile (rows per packed vreg)


def _round_up(x, m):
    return (x + m - 1) // m * m


def _basic_block_kernel(x_ref, m_ref, w1_ref, b1_ref, w2_ref, b2_ref, out_ref,
                        *, W, cp1, cp2, has_projection):
    """Fused BasicBlock for B images packed along the lane axis.

    x_ref  : (Cin, L)          bf16  B images, channels on sublanes, L = B*HWp
    m_ref  : (9, L)            f32   multiplicative border/pad masks (per tap)
    w1_ref : (C, 9*cp1)        bf16  conv1 slab (BN1 scale folded, K padded)
    b1_ref : (C, 1)            f32   BN1 bias
    w2_ref : (C, 9*cp2[+cp1])  bf16  conv2 slab (+ folded 1x1 shortcut)
    b2_ref : (C, 1)            f32   BN2 (+ shortcut-BN) bias
    out_ref: (C, L)            f32   lane-dense output slab
    """
    L = x_ref.shape[1]
    masks = m_ref[...]                              # (9, L) f32

    def pad_rows(v, rows_p):
        rows = v.shape[0]
        if rows_p == rows:
            return v
        return jnp.concatenate(
            [v, jnp.zeros((rows_p - rows, L), v.dtype)], axis=0)

    def tap_pieces(v):
        """9 shifted+masked copies of v (f32 rolls), each cast to bf16."""
        pieces = []
        k = 0
        for odh in (-1, 0, 1):
            for odw in (-1, 0, 1):
                off = odh * W + odw
                # Value at flat lane p becomes v[p + off] (XLU lane roll); the
                # precomputed mask zeroes conv borders, image-to-image leakage
                # of the batched roll, and the HW->HWp pad tail.
                s = v if off == 0 else pltpu.roll(v, shift=(-off) % L, axis=1)
                pieces.append((s * masks[k:k + 1, :]).astype(jnp.bfloat16))
                k += 1
        return pieces

    x = x_ref[...].astype(jnp.float32)              # (Cin, L)
    xp = pad_rows(x, cp1)                           # 16-row-aligned tap pieces

    # conv1 (3x3, pad 1) + BN1 + ReLU: one K = 9*cp1 bf16 matmul, f32 acc.
    rhs1 = jnp.concatenate(tap_pieces(xp), axis=0)  # (9*cp1, L) bf16
    o1 = jnp.dot(w1_ref[...], rhs1, preferred_element_type=jnp.float32)
    o1 = jnp.maximum(o1 + b1_ref[...], 0.0)         # (C, L) f32

    # conv2 (3x3, pad 1) + BN2, with the 1x1 projection shortcut (if any)
    # fused into the same matmul by appending x's (padded) channels.
    pieces2 = tap_pieces(pad_rows(o1, cp2))
    if has_projection:
        pieces2.append(xp.astype(jnp.bfloat16))
    rhs2 = jnp.concatenate(pieces2, axis=0)
    out = jnp.dot(w2_ref[...], rhs2, preferred_element_type=jnp.float32)
    out = out + b2_ref[...]
    if not has_projection:
        out = out + x                               # identity shortcut
    out_ref[...] = jnp.maximum(out, 0.0).astype(out_ref.dtype)


def _choose_batch(N, Cin, C, HWp, cp1, cp2, has_projection):
    """Images per grid step.

    Batch as many images as fit a ~24 MiB VMEM working-set budget (wide-N
    matmuls + amortized per-step overhead), capped at 8 and -- when N > 1 --
    at ceil(N/2) so a v7x chip's two TensorCores both receive at least one
    'parallel' grid block."""
    k2 = 9 * cp2 + (cp1 if has_projection else 0)
    bytes_per_image = HWp * (
        2 * Cin * 2        # bf16 input block, double-buffered
        + 2 * C * 4        # f32 output block, double-buffered
        + 9 * cp1 * 2      # conv1 im2col slab (bf16)
        + k2 * 2           # conv2 (+ shortcut) im2col slab (bf16)
        + 3 * cp2 * 4)     # f32 o1 / rolled-tap temporaries
    budget = 24 * 1024 * 1024
    b = max(1, min(8, budget // bytes_per_image))
    if N > 1:
        b = min(b, -(-N // 2))
    return max(1, min(b, N))


def _make_masks(H, W, HWp, B):
    """(9, B*HWp) f32 multiplicative masks, one row per 3x3 tap.

    mask[k, l] is 1.0 iff lane l (image slot l // HWp, flat position l % HWp)
    is a real pixel AND its tap-k neighbour lies inside the same image
    (zero-padding semantics of the 3x3 conv)."""
    HW = H * W
    p = jnp.arange(B * HWp, dtype=jnp.int32) % HWp
    in_img = p < HW
    h = p // W
    w = p % W
    rows = []
    for odh in (-1, 0, 1):
        for odw in (-1, 0, 1):
            valid = in_img
            if odh == -1:
                valid = valid & (h >= 1)
            elif odh == 1:
                valid = valid & (h <= H - 2)
            if odw == -1:
                valid = valid & (w >= 1)
            elif odw == 1:
                valid = valid & (w <= W - 2)
            rows.append(valid)
    return jnp.stack(rows, axis=0).astype(jnp.float32)


@functools.partial(jax.jit, static_argnames=("identity_shortcut",))
def basic_block_forward(x_nchw, kernel_params, identity_shortcut=False):
    """BasicBlock forward on NCHW input via the fused Pallas kernel."""
    w1s, b1, w2s, b2 = kernel_params
    N, Cin, H, W = x_nchw.shape
    C = w1s.shape[0]
    HW = H * W
    HWp = _round_up(HW, _LANE)            # lane-dense stores for any H, W
    cp1 = _round_up(Cin, _SUB_BF16)       # sublane-tile-aligned tap pieces
    cp2 = _round_up(C, _SUB_BF16)
    has_projection = not identity_shortcut

    B = _choose_batch(N, Cin, C, HWp, cp1, cp2, has_projection)
    NP = _round_up(N, B)
    L = B * HWp                           # lanes per grid block
    num_blocks = NP // B

    # Channels-on-sublanes, images along lanes, bf16 in HBM (half the input
    # DMA bytes).  The NCHW -> (Cin, NP*HWp) transpose/pad is a one-off XLA
    # reshuffle in the wrapper, keeping the kernel free of in-kernel relayouts.
    xt = jnp.transpose(x_nchw.astype(jnp.bfloat16).reshape(N, Cin, HW),
                       (1, 0, 2))
    xt = jnp.pad(xt, ((0, 0), (0, NP - N), (0, HWp - HW)))
    x2 = xt.reshape(Cin, NP * HWp)

    masks = _make_masks(H, W, HWp, B)     # (9, L), constant block -> VMEM-resident

    kernel = functools.partial(_basic_block_kernel, W=W, cp1=cp1, cp2=cp2,
                               has_projection=has_projection)

    out = pl.pallas_call(
        kernel,
        out_shape=jax.ShapeDtypeStruct((C, NP * HWp), jnp.float32),
        grid=(num_blocks,),
        in_specs=[
            pl.BlockSpec((Cin, L), lambda i: (0, i)),
            pl.BlockSpec((9, L), lambda i: (0, 0)),
            pl.BlockSpec(w1s.shape, lambda i: (0, 0)),
            pl.BlockSpec((C, 1), lambda i: (0, 0)),
            pl.BlockSpec(w2s.shape, lambda i: (0, 0)),
            pl.BlockSpec((C, 1), lambda i: (0, 0)),
        ],
        out_specs=pl.BlockSpec((C, L), lambda i: (0, i)),
        compiler_params=pltpu.CompilerParams(
            dimension_semantics=("parallel",),
            vmem_limit_bytes=32 * 1024 * 1024),
    )(x2, masks, w1s, b1, w2s, b2)

    out = out.reshape(C, NP, HWp)[:, :N, :HW]
    return jnp.transpose(out, (1, 0, 2)).reshape(N, C, H, W)


def _fold_bn(gamma, beta, mean, var, eps=_EPS):
    scale = gamma / jnp.sqrt(var + eps)
    return scale, beta - mean * scale


def prepare_kernel_params(raw_params, identity_shortcut):
    """Fold BN into the conv weights and flatten them into padded MXU slabs.

    Column layout matches the kernel's im2col: tap-major (odh, odw), channel
    innermost, each tap block zero-padded to a multiple of 16 channels so the
    kernel's bf16 concatenate stays sublane-tile aligned."""
    w1, g1, be1, m1, v1, w2, g2, be2, m2, v2, *sc = raw_params
    C, Cin = w1.shape[0], w1.shape[1]
    cp1 = _round_up(Cin, _SUB_BF16)
    cp2 = _round_up(C, _SUB_BF16)

    s1, b1 = _fold_bn(g1, be1, m1, v1)
    s2, b2 = _fold_bn(g2, be2, m2, v2)

    def slab_3x3(w, s, cp):
        co, ci = w.shape[0], w.shape[1]
        wt = jnp.transpose(w, (0, 2, 3, 1))                 # (Co, dh, dw, Ci)
        wt = jnp.pad(wt, ((0, 0), (0, 0), (0, 0), (0, cp - ci)))
        return wt.reshape(co, 9 * cp) * s[:, None]

    w1_slab = slab_3x3(w1, s1, cp1)
    w2_slab = slab_3x3(w2, s2, cp2)

    if identity_shortcut:
        b2_tot = b2
    else:
        wsc, gsc, besc, msc, vsc = sc
        ssc, bsc = _fold_bn(gsc, besc, msc, vsc)
        wsc_slab = jnp.pad(wsc.reshape(C, Cin) * ssc[:, None],
                           ((0, 0), (0, cp1 - Cin)))
        w2_slab = jnp.concatenate([w2_slab, wsc_slab], axis=1)
        b2_tot = b2 + bsc

    # NOTE: BN scales are folded into the bf16 slabs (keeps the projection
    # shortcut fused into a single matmul); adds ~0.4% weight rounding error.
    return (w1_slab.astype(jnp.bfloat16),
            b1.reshape(C, 1).astype(jnp.float32),
            w2_slab.astype(jnp.bfloat16),
            b2_tot.reshape(C, 1).astype(jnp.float32))


def reference_forward(x_nchw, raw_params, identity_shortcut):
    """Pure-JAX (lax.conv, f32 HIGHEST) reference of the PyTorch module."""
    w1, g1, be1, m1, v1, w2, g2, be2, m2, v2, *sc = raw_params
    dn = ('NCHW', 'OIHW', 'NCHW')

    def conv(x, w):
        return jax.lax.conv_general_dilated(
            x, w, window_strides=(1, 1), padding='SAME',
            dimension_numbers=dn, precision=jax.lax.Precision.HIGHEST)

    def bn(y, g, b, m, v):
        s = g / jnp.sqrt(v + _EPS)
        return y * s.reshape(1, -1, 1, 1) + (b - m * s).reshape(1, -1, 1, 1)

    o = jnp.maximum(bn(conv(x_nchw, w1), g1, be1, m1, v1), 0.0)
    o = bn(conv(o, w2), g2, be2, m2, v2)
    if identity_shortcut:
        shortcut = x_nchw
    else:
        wsc, gsc, besc, msc, vsc = sc
        shortcut = bn(conv(x_nchw, wsc), gsc, besc, msc, vsc)
    return jnp.maximum(o + shortcut, 0.0)


def make_raw_params(key, in_planes, planes, identity_shortcut):
    """Deterministic synthetic Conv/BatchNorm parameters (inference mode)."""
    ks = jax.random.split(key, 15)

    def bn_params(i, c):
        gamma = 1.0 + 0.1 * jax.random.normal(ks[i], (c,), jnp.float32)
        beta = 0.1 * jax.random.normal(ks[i + 1], (c,), jnp.float32)
        mean = 0.1 * jax.random.normal(ks[i + 2], (c,), jnp.float32)
        var = jax.random.uniform(ks[i + 3], (c,), jnp.float32, 0.5, 1.5)
        return gamma, beta, mean, var

    w1 = 0.2 * jax.random.normal(ks[0], (planes, in_planes, 3, 3), jnp.float32)
    w2 = 0.2 * jax.random.normal(ks[1], (planes, planes, 3, 3), jnp.float32)
    p = (w1,) + bn_params(2, planes) + (w2,) + bn_params(6, planes)
    if identity_shortcut:
        return p
    wsc = 0.2 * jax.random.normal(ks[10], (planes, in_planes, 1, 1),
                                  jnp.float32)
    return p + (wsc,) + bn_params(11, planes)


if __name__ == "__main__":
    key = jax.random.PRNGKey(0)
    kx1, kp1, kx2, kp2 = jax.random.split(key, 4)

    # Tolerances reflect bf16 MXU operands / bf16 input with f32 accumulation.
    RTOL, ATOL = 5e-2, 1e-1

    # Case 1: projection shortcut (in_planes != planes), stride = 1, HW = 256.
    N, Cin, C, H, W = 2, 4, 8, 16, 16
    x = jax.random.normal(kx1, (N, Cin, H, W), jnp.float32)
    raw = make_raw_params(kp1, Cin, C, identity_shortcut=False)
    kparams = prepare_kernel_params(raw, identity_shortcut=False)
    out = jax.block_until_ready(
        basic_block_forward(x, kparams, identity_shortcut=False))
    ref = reference_forward(x, raw, identity_shortcut=False)
    assert out.shape == (N, C, H, W), out.shape
    assert jnp.allclose(out, ref, rtol=RTOL, atol=ATOL), \
        float(jnp.max(jnp.abs(out - ref)))

    # Case 2: identity shortcut, N not a multiple of the image batch, and
    # H*W = 196 not a multiple of 128 — exercises lane padding, batch padding
    # and the multi-image-per-grid-step path.
    N2, C2, H2, W2 = 5, 8, 14, 14
    x2 = jax.random.normal(kx2, (N2, C2, H2, W2), jnp.float32)
    raw2 = make_raw_params(kp2, C2, C2, identity_shortcut=True)
    kparams2 = prepare_kernel_params(raw2, identity_shortcut=True)
    out2 = jax.block_until_ready(
        basic_block_forward(x2, kparams2, identity_shortcut=True))
    ref2 = reference_forward(x2, raw2, identity_shortcut=True)
    assert out2.shape == (N2, C2, H2, W2), out2.shape
    assert jnp.allclose(out2, ref2, rtol=RTOL, atol=ATOL), \
        float(jnp.max(jnp.abs(out2 - ref2)))

    print("KERNEL_OK")
</pallas_src>

<mosaic_0001>
module attributes {stable_mosaic.version = 11 : i64} {
  func.func @_basic_block_kernel(%arg0: i32, %arg1: memref<4x256xbf16, #tpu.memory_space<vmem>>, %arg2: memref<9x256xf32, #tpu.memory_space<vmem>>, %arg3: memref<8x144xbf16, #tpu.memory_space<vmem>>, %arg4: memref<8x1xf32, #tpu.memory_space<vmem>>, %arg5: memref<8x160xbf16, #tpu.memory_space<vmem>>, %arg6: memref<8x1xf32, #tpu.memory_space<vmem>>, %arg7: memref<8x256xf32, #tpu.memory_space<vmem>>) attributes {dimension_semantics = [#tpu.dimension_semantics<parallel>], iteration_bounds = array<i64: 2>, scalar_prefetch = 0 : i64, scratch_operands = 0 : i64, tpu.core_type = #tpu.core_type<tc>, window_params = [{transform_indices = @transform_0, window_bounds = array<i64: 4, 256>}, {pipeline_mode = #tpu.pipeline_mode<synchronous>, transform_indices = @transform_1, window_bounds = array<i64: 9, 256>}, {pipeline_mode = #tpu.pipeline_mode<synchronous>, transform_indices = @transform_2, window_bounds = array<i64: 8, 144>}, {pipeline_mode = #tpu.pipeline_mode<synchronous>, transform_indices = @transform_3, window_bounds = array<i64: 8, 1>}, {pipeline_mode = #tpu.pipeline_mode<synchronous>, transform_indices = @transform_4, window_bounds = array<i64: 8, 160>}, {pipeline_mode = #tpu.pipeline_mode<synchronous>, transform_indices = @transform_5, window_bounds = array<i64: 8, 1>}, {transform_indices = @transform_6, window_bounds = array<i64: 8, 256>}]} {
    %c0 = arith.constant 0 : index
    %c0_0 = arith.constant 0 : index
    %0 = vector.load %arg2[%c0, %c0_0] : memref<9x256xf32, #tpu.memory_space<vmem>>, vector<9x256xf32>
    %c0_1 = arith.constant 0 : index
    %c0_2 = arith.constant 0 : index
    %1 = vector.load %arg1[%c0_1, %c0_2] : memref<4x256xbf16, #tpu.memory_space<vmem>>, vector<4x256xbf16>
    %2 = arith.extf %1 : vector<4x256xbf16> to vector<4x256xf32>
    %cst = arith.constant 0.000000e+00 : f32
    %3 = vector.broadcast %cst : f32 to vector<12x256xf32>
    %4 = tpu.concatenate %2, %3 in 0 : vector<4x256xf32>, vector<12x256xf32> -> vector<16x256xf32>
    %c17_i32 = arith.constant 17 : i32
    %5 = tpu.dynamic_rotate %4 by %c17_i32 dim 1 : vector<16x256xf32>, i32 -> vector<16x256xf32>
    %6 = vector.extract_strided_slice %0 {offsets = [0, 0], sizes = [1, 256], strides = [1, 1]} : vector<9x256xf32> to vector<1x256xf32>
    %7 = vector.broadcast %6 : vector<1x256xf32> to vector<16x256xf32>
    %8 = arith.mulf %5, %7 : vector<16x256xf32>
    %9 = arith.truncf %8 : vector<16x256xf32> to vector<16x256xbf16>
    %c16_i32 = arith.constant 16 : i32
    %10 = tpu.dynamic_rotate %4 by %c16_i32 dim 1 : vector<16x256xf32>, i32 -> vector<16x256xf32>
    %11 = vector.extract_strided_slice %0 {offsets = [1, 0], sizes = [1, 256], strides = [1, 1]} : vector<9x256xf32> to vector<1x256xf32>
    %12 = vector.broadcast %11 : vector<1x256xf32> to vector<16x256xf32>
    %13 = arith.mulf %10, %12 : vector<16x256xf32>
    %14 = arith.truncf %13 : vector<16x256xf32> to vector<16x256xbf16>
    %c15_i32 = arith.constant 15 : i32
    %15 = tpu.dynamic_rotate %4 by %c15_i32 dim 1 : vector<16x256xf32>, i32 -> vector<16x256xf32>
    %16 = vector.extract_strided_slice %0 {offsets = [2, 0], sizes = [1, 256], strides = [1, 1]} : vector<9x256xf32> to vector<1x256xf32>
    %17 = vector.broadcast %16 : vector<1x256xf32> to vector<16x256xf32>
    %18 = arith.mulf %15, %17 : vector<16x256xf32>
    %19 = arith.truncf %18 : vector<16x256xf32> to vector<16x256xbf16>
    %c1_i32 = arith.constant 1 : i32
    %20 = tpu.dynamic_rotate %4 by %c1_i32 dim 1 : vector<16x256xf32>, i32 -> vector<16x256xf32>
    %21 = vector.extract_strided_slice %0 {offsets = [3, 0], sizes = [1, 256], strides = [1, 1]} : vector<9x256xf32> to vector<1x256xf32>
    %22 = vector.broadcast %21 : vector<1x256xf32> to vector<16x256xf32>
    %23 = arith.mulf %20, %22 : vector<16x256xf32>
    %24 = arith.truncf %23 : vector<16x256xf32> to vector<16x256xbf16>
    %25 = vector.extract_strided_slice %0 {offsets = [4, 0], sizes = [1, 256], strides = [1, 1]} : vector<9x256xf32> to vector<1x256xf32>
    %26 = vector.broadcast %25 : vector<1x256xf32> to vector<16x256xf32>
    %27 = arith.mulf %4, %26 : vector<16x256xf32>
    %28 = arith.truncf %27 : vector<16x256xf32> to vector<16x256xbf16>
    %c255_i32 = arith.constant 255 : i32
    %29 = tpu.dynamic_rotate %4 by %c255_i32 dim 1 : vector<16x256xf32>, i32 -> vector<16x256xf32>
    %30 = vector.extract_strided_slice %0 {offsets = [5, 0], sizes = [1, 256], strides = [1, 1]} : vector<9x256xf32> to vector<1x256xf32>
    %31 = vector.broadcast %30 : vector<1x256xf32> to vector<16x256xf32>
    %32 = arith.mulf %29, %31 : vector<16x256xf32>
    %33 = arith.truncf %32 : vector<16x256xf32> to vector<16x256xbf16>
    %c241_i32 = arith.constant 241 : i32
    %34 = tpu.dynamic_rotate %4 by %c241_i32 dim 1 : vector<16x256xf32>, i32 -> vector<16x256xf32>
    %35 = vector.extract_strided_slice %0 {offsets = [6, 0], sizes = [1, 256], strides = [1, 1]} : vector<9x256xf32> to vector<1x256xf32>
    %36 = vector.broadcast %35 : vector<1x256xf32> to vector<16x256xf32>
    %37 = arith.mulf %34, %36 : vector<16x256xf32>
    %38 = arith.truncf %37 : vector<16x256xf32> to vector<16x256xbf16>
    %c240_i32 = arith.constant 240 : i32
    %39 = tpu.dynamic_rotate %4 by %c240_i32 dim 1 : vector<16x256xf32>, i32 -> vector<16x256xf32>
    %40 = vector.extract_strided_slice %0 {offsets = [7, 0], sizes = [1, 256], strides = [1, 1]} : vector<9x256xf32> to vector<1x256xf32>
    %41 = vector.broadcast %40 : vector<1x256xf32> to vector<16x256xf32>
    %42 = arith.mulf %39, %41 : vector<16x256xf32>
    %43 = arith.truncf %42 : vector<16x256xf32> to vector<16x256xbf16>
    %c239_i32 = arith.constant 239 : i32
    %44 = tpu.dynamic_rotate %4 by %c239_i32 dim 1 : vector<16x256xf32>, i32 -> vector<16x256xf32>
    %45 = vector.extract_strided_slice %0 {offsets = [8, 0], sizes = [1, 256], strides = [1, 1]} : vector<9x256xf32> to vector<1x256xf32>
    %46 = vector.broadcast %45 : vector<1x256xf32> to vector<16x256xf32>
    %47 = arith.mulf %44, %46 : vector<16x256xf32>
    %48 = arith.truncf %47 : vector<16x256xf32> to vector<16x256xbf16>
    %49 = tpu.concatenate %9, %14, %19, %24, %28, %33, %38, %43, %48 in 0 : vector<16x256xbf16>, vector<16x256xbf16>, vector<16x256xbf16>, vector<16x256xbf16>, vector<16x256xbf16>, vector<16x256xbf16>, vector<16x256xbf16>, vector<16x256xbf16>, vector<16x256xbf16> -> vector<144x256xbf16>
    %c0_3 = arith.constant 0 : index
    %c0_4 = arith.constant 0 : index
    %50 = vector.load %arg3[%c0_3, %c0_4] : memref<8x144xbf16, #tpu.memory_space<vmem>>, vector<8x144xbf16>
    %cst_5 = arith.constant dense<0.000000e+00> : vector<8x256xf32>
    %51 = tpu.matmul %50, %49, %cst_5 {dimension_numbers = #tpu.dot_dimension_numbers<[1], [0], [0], [1], [0, 0, 1, 1], [], []>} : vector<8x144xbf16>, vector<144x256xbf16>, vector<8x256xf32> -> vector<8x256xf32>
    %c0_6 = arith.constant 0 : index
    %c0_7 = arith.constant 0 : index
    %52 = vector.load %arg4[%c0_6, %c0_7] : memref<8x1xf32, #tpu.memory_space<vmem>>, vector<8x1xf32>
    %53 = vector.broadcast %52 : vector<8x1xf32> to vector<8x256xf32>
    %54 = arith.addf %51, %53 : vector<8x256xf32>
    %cst_8 = arith.constant 0.000000e+00 : f32
    %55 = vector.broadcast %cst_8 : f32 to vector<8x256xf32>
    %56 = arith.maximumf %54, %55 : vector<8x256xf32>
    %cst_9 = arith.constant 0.000000e+00 : f32
    %57 = vector.broadcast %cst_9 : f32 to vector<8x256xf32>
    %58 = tpu.concatenate %56, %57 in 0 : vector<8x256xf32>, vector<8x256xf32> -> vector<16x256xf32>
    %c17_i32_10 = arith.constant 17 : i32
    %59 = tpu.dynamic_rotate %58 by %c17_i32_10 dim 1 : vector<16x256xf32>, i32 -> vector<16x256xf32>
    %60 = vector.extract_strided_slice %0 {offsets = [0, 0], sizes = [1, 256], strides = [1, 1]} : vector<9x256xf32> to vector<1x256xf32>
    %61 = vector.broadcast %60 : vector<1x256xf32> to vector<16x256xf32>
    %62 = arith.mulf %59, %61 : vector<16x256xf32>
    %63 = arith.truncf %62 : vector<16x256xf32> to vector<16x256xbf16>
    %c16_i32_11 = arith.constant 16 : i32
    %64 = tpu.dynamic_rotate %58 by %c16_i32_11 dim 1 : vector<16x256xf32>, i32 -> vector<16x256xf32>
    %65 = vector.extract_strided_slice %0 {offsets = [1, 0], sizes = [1, 256], strides = [1, 1]} : vector<9x256xf32> to vector<1x256xf32>
    %66 = vector.broadcast %65 : vector<1x256xf32> to vector<16x256xf32>
    %67 = arith.mulf %64, %66 : vector<16x256xf32>
    %68 = arith.truncf %67 : vector<16x256xf32> to vector<16x256xbf16>
    %c15_i32_12 = arith.constant 15 : i32
    %69 = tpu.dynamic_rotate %58 by %c15_i32_12 dim 1 : vector<16x256xf32>, i32 -> vector<16x256xf32>
    %70 = vector.extract_strided_slice %0 {offsets = [2, 0], sizes = [1, 256], strides = [1, 1]} : vector<9x256xf32> to vector<1x256xf32>
    %71 = vector.broadcast %70 : vector<1x256xf32> to vector<16x256xf32>
    %72 = arith.mulf %69, %71 : vector<16x256xf32>
    %73 = arith.truncf %72 : vector<16x256xf32> to vector<16x256xbf16>
    %c1_i32_13 = arith.constant 1 : i32
    %74 = tpu.dynamic_rotate %58 by %c1_i32_13 dim 1 : vector<16x256xf32>, i32 -> vector<16x256xf32>
    %75 = vector.extract_strided_slice %0 {offsets = [3, 0], sizes = [1, 256], strides = [1, 1]} : vector<9x256xf32> to vector<1x256xf32>
    %76 = vector.broadcast %75 : vector<1x256xf32> to vector<16x256xf32>
    %77 = arith.mulf %74, %76 : vector<16x256xf32>
    %78 = arith.truncf %77 : vector<16x256xf32> to vector<16x256xbf16>
    %79 = vector.extract_strided_slice %0 {offsets = [4, 0], sizes = [1, 256], strides = [1, 1]} : vector<9x256xf32> to vector<1x256xf32>
    %80 = vector.broadcast %79 : vector<1x256xf32> to vector<16x256xf32>
    %81 = arith.mulf %58, %80 : vector<16x256xf32>
    %82 = arith.truncf %81 : vector<16x256xf32> to vector<16x256xbf16>
    %c255_i32_14 = arith.constant 255 : i32
    %83 = tpu.dynamic_rotate %58 by %c255_i32_14 dim 1 : vector<16x256xf32>, i32 -> vector<16x256xf32>
    %84 = vector.extract_strided_slice %0 {offsets = [5, 0], sizes = [1, 256], strides = [1, 1]} : vector<9x256xf32> to vector<1x256xf32>
    %85 = vector.broadcast %84 : vector<1x256xf32> to vector<16x256xf32>
    %86 = arith.mulf %83, %85 : vector<16x256xf32>
    %87 = arith.truncf %86 : vector<16x256xf32> to vector<16x256xbf16>
    %c241_i32_15 = arith.constant 241 : i32
    %88 = tpu.dynamic_rotate %58 by %c241_i32_15 dim 1 : vector<16x256xf32>, i32 -> vector<16x256xf32>
    %89 = vector.extract_strided_slice %0 {offsets = [6, 0], sizes = [1, 256], strides = [1, 1]} : vector<9x256xf32> to vector<1x256xf32>
    %90 = vector.broadcast %89 : vector<1x256xf32> to vector<16x256xf32>
    %91 = arith.mulf %88, %90 : vector<16x256xf32>
    %92 = arith.truncf %91 : vector<16x256xf32> to vector<16x256xbf16>
    %c240_i32_16 = arith.constant 240 : i32
    %93 = tpu.dynamic_rotate %58 by %c240_i32_16 dim 1 : vector<16x256xf32>, i32 -> vector<16x256xf32>
    %94 = vector.extract_strided_slice %0 {offsets = [7, 0], sizes = [1, 256], strides = [1, 1]} : vector<9x256xf32> to vector<1x256xf32>
    %95 = vector.broadcast %94 : vector<1x256xf32> to vector<16x256xf32>
    %96 = arith.mulf %93, %95 : vector<16x256xf32>
    %97 = arith.truncf %96 : vector<16x256xf32> to vector<16x256xbf16>
    %c239_i32_17 = arith.constant 239 : i32
    %98 = tpu.dynamic_rotate %58 by %c239_i32_17 dim 1 : vector<16x256xf32>, i32 -> vector<16x256xf32>
    %99 = vector.extract_strided_slice %0 {offsets = [8, 0], sizes = [1, 256], strides = [1, 1]} : vector<9x256xf32> to vector<1x256xf32>
    %100 = vector.broadcast %99 : vector<1x256xf32> to vector<16x256xf32>
    %101 = arith.mulf %98, %100 : vector<16x256xf32>
    %102 = arith.truncf %101 : vector<16x256xf32> to vector<16x256xbf16>
    %103 = arith.truncf %4 : vector<16x256xf32> to vector<16x256xbf16>
    %104 = tpu.concatenate %63, %68, %73, %78, %82, %87, %92, %97, %102, %103 in 0 : vector<16x256xbf16>, vector<16x256xbf16>, vector<16x256xbf16>, vector<16x256xbf16>, vector<16x256xbf16>, vector<16x256xbf16>, vector<16x256xbf16>, vector<16x256xbf16>, vector<16x256xbf16>, vector<16x256xbf16> -> vector<160x256xbf16>
    %c0_18 = arith.constant 0 : index
    %c0_19 = arith.constant 0 : index
    %105 = vector.load %arg5[%c0_18, %c0_19] : memref<8x160xbf16, #tpu.memory_space<vmem>>, vector<8x160xbf16>
    %cst_20 = arith.constant dense<0.000000e+00> : vector<8x256xf32>
    %106 = tpu.matmul %105, %104, %cst_20 {dimension_numbers = #tpu.dot_dimension_numbers<[1], [0], [0], [1], [0, 0, 1, 1], [], []>} : vector<8x160xbf16>, vector<160x256xbf16>, vector<8x256xf32> -> vector<8x256xf32>
    %c0_21 = arith.constant 0 : index
    %c0_22 = arith.constant 0 : index
    %107 = vector.load %arg6[%c0_21, %c0_22] : memref<8x1xf32, #tpu.memory_space<vmem>>, vector<8x1xf32>
    %108 = vector.broadcast %107 : vector<8x1xf32> to vector<8x256xf32>
    %109 = arith.addf %106, %108 : vector<8x256xf32>
    %cst_23 = arith.constant 0.000000e+00 : f32
    %110 = vector.broadcast %cst_23 : f32 to vector<8x256xf32>
    %111 = arith.maximumf %109, %110 : vector<8x256xf32>
    %c0_24 = arith.constant 0 : index
    %c0_25 = arith.constant 0 : index
    %112 = vector.load %arg7[%c0_24, %c0_25] : memref<8x256xf32, #tpu.memory_space<vmem>>, vector<8x256xf32>
    tpu.vector_store %arg7[%c0_24, %c0_25], %111 {strides = array<i32>} : memref<8x256xf32, #tpu.memory_space<vmem>>, vector<8x256xf32>,
    return
  }
  func.func @transform_0(%arg0: i32) -> (i32, i32) {
    %c0_i32 = arith.constant 0 : i32
    %c0_i32_0 = arith.constant 0 : i32
    return %c0_i32, %arg0 : i32, i32
  }
  func.func @transform_1(%arg0: i32) -> (i32, i32) {
    %c0_i32 = arith.constant 0 : i32
    %c0_i32_0 = arith.constant 0 : i32
    %c0_i32_1 = arith.constant 0 : i32
    return %c0_i32, %c0_i32_0 : i32, i32
  }
  func.func @transform_2(%arg0: i32) -> (i32, i32) {
    %c0_i32 = arith.constant 0 : i32
    %c0_i32_0 = arith.constant 0 : i32
    %c0_i32_1 = arith.constant 0 : i32
    return %c0_i32, %c0_i32_0 : i32, i32
  }
  func.func @transform_3(%arg0: i32) -> (i32, i32) {
    %c0_i32 = arith.constant 0 : i32
    %c0_i32_0 = arith.constant 0 : i32
    %c0_i32_1 = arith.constant 0 : i32
    return %c0_i32, %c0_i32_0 : i32, i32
  }
  func.func @transform_4(%arg0: i32) -> (i32, i32) {
    %c0_i32 = arith.constant 0 : i32
    %c0_i32_0 = arith.constant 0 : i32
    %c0_i32_1 = arith.constant 0 : i32
    return %c0_i32, %c0_i32_0 : i32, i32
  }
  func.func @transform_5(%arg0: i32) -> (i32, i32) {
    %c0_i32 = arith.constant 0 : i32
    %c0_i32_0 = arith.constant 0 : i32
    %c0_i32_1 = arith.constant 0 : i32
    return %c0_i32, %c0_i32_0 : i32, i32
  }
  func.func @transform_6(%arg0: i32) -> (i32, i32) {
    %c0_i32 = arith.constant 0 : i32
    %c0_i32_0 = arith.constant 0 : i32
    return %c0_i32, %arg0 : i32, i32
  }
}

</mosaic_0001>

<bundles_post_ra>
// kernel: basic_block_forward.1
= control target key start
LH: loop header
LB: loop body
LE: loop exit
PB: predicated region body
PF: predicated region fallthrough
CT: control target
= control target key end

     0   :  { %s875_s21 = smov 0   ;;  %s1261_s0 = inlined_call_operand.vmem [shape: bf16[4,512], index: 0, kind: input, shape index: {}]   ;;  %s1262_s1 = inlined_call_operand.vmem [shape: f32[9,256], index: 1, kind: input, shape index: {}]   ;;  %s1263_s2 = inlined_call_operand.vmem [shape: bf16[8,144], index: 2, kind: input, shape index: {}]   ;;  %s1264_s3 = inlined_call_operand.vmem [shape: f32[8,1], index: 3, kind: input, shape index: {}]   ;;  %s1265_s4 = inlined_call_operand.vmem [shape: bf16[8,160], index: 4, kind: input, shape index: {}]   ;;  %s1266_s5 = inlined_call_operand.vmem [shape: f32[8,1], index: 5, kind: input, shape index: {}]   ;;  %s1267_s6 = inlined_call_operand.vmem [shape: f32[8,512], index: 6, kind: output, shape index: {}]  }
   0x1 LB: > { %s732_s22 = sadd.s32 4294967295, %s827_s21   ;;  %p736_p0 = scmp.ge.s32.totalorder %s827_s21, 1  ;;  %s827_s21 = sphi %s875_s21, %s16_s21  }
   0x2   : > { %p213_p1 = scmp.lt.s32.totalorder %s827_s21, 3 }
   0x4   : > { %p214_p2 = pnand %p736_p0, %p213_p1 }
   0x5   : > { %s737_s23 = sshll.u32 (!%p214_p2), %s732_s22, 1  ;;  %s829_s28 = smov (!%p214_p2), 112  }
   0x6   : > { %217 = sbr.rel (%p214_p2) target bundleno = 742 (0x2e6), region = 44  ;;  %p244_p3 = scmp.lt.s32.totalorder (!%p214_p2), %s737_s23, 3 }
   0x7   : > { %s830_s29 = smov (!%p214_p2), 113   ;;  %s832_s30 = smov (!%p214_p2), 127  }
   0x8   : > { %s833_s7 = smov (!%p214_p2), 1   ;;  %s834_s8 = smov (!%p214_p2), 15  }
   0x9   : > { %s835_s9 = smov (!%p214_p2), 16   ;;  %s836_s10 = smov (!%p214_p2), 17  }
   0xa   : > { %s837_s13 = smov (!%p214_p2), 111  }
   0xb   : > { %s1269_s23 = smov (!%p244_p3, %s737_s23), 3  ;;  %vm265_vm0 = vcmask 1043456   ;;  %v831_v6 = vmov 0.0   ;;  %v929_v7 = vld [vmem:[%s1263_s2] sm:$0xff]  ;;  %vm481_vm1 = vcmask 130048   ;;  %v838_v10 = vmov 0  }
   0xc   : > { %s738_s24 = sshll.u32 %s1269_s23, 1  ;;  %v744_v8 = vcombine.high %v929_v7, %v929_v7  ;;  %v469_v9 = vld [vmem:[%s1264_s3] sm:$0xff]  ;;  %816 = vset.pattern.permute.xlu0 %v838_v10  ;;  %v274_v11 = vlaneseq  ;;  %v953_v17 = vld [vmem:[%s1262_s1 + $0x8] sm:$0xff]  ;;  %vm627_vm10 = vcmask 261120   ;;  %vm839_vm11 = vmmov 1  }
   0xd   : > { %s247_s27 = scalar_lea.vmem %s1261_s0, %s738_s24  ;;  %v948_v16 = vld [vmem:[%s1262_s1] sm:$0xff]  ;;  %vm748_vm12 = vmpackc.low %vm839_vm11, %vm265_vm0 }
   0xe   : > { %v260_v0 = vld [vmem:[%s247_s27] sm:$0xf]  ;;  %745 = vmatprep.mubr.msk.bf16.mxu0 %vm481_vm1, %v744_v8  ;;  %v939_v12 = vshrl.u32 %v274_v11, 7  ;;  %v941_v13 = vand.u32 127, %v274_v11 }
   0xf   : > { %v889_v1 = vunpack.c.l.bf16 %v260_v0 }
  0x10   : > { %v433_v14 = vsub.s32 7, %v939_v12  ;;  %v410_v15 = vsub.s32 6, %v939_v12  ;;  %vm405_vm2 = vcmp.lt.s32.totalorder %v941_v13, 113  ;;  %vm428_vm3 = vcmp.lt.s32.totalorder %v941_v13, 112 }
  0x11   : > { %v893_v2 = vcombine.high %v889_v1, %v889_v1  ;;  %v897_v3 = vsel %vm265_vm0, %v889_v1, 0.0  ;;  %v387_v27 = vsub.s32 5, %v939_v12  ;;  %v364_v28 = vsub.s32 4, %v939_v12 }
  0x12   : > { %v957_v20 = vrot.slane %v948_v16, %v433_v14  ;;  %v960_v21 = vrot.slane %v953_v17, %v433_v14  ;;  %v963_v22 = vrot.slane %v953_v17, %v410_v15  ;;  %v975_v33 = vrot.slane %v948_v16, %v410_v15 }
  0x13   : > { %v901_v4 = vsel %vm265_vm0, %v893_v2, 0.0  ;;  %v992_v42 = vrot.slane %v948_v16, %v387_v27  ;;  %v995_v43 = vrot.slane %v953_v17, %v387_v27  ;;  %v998_v44 = vrot.slane %v953_v17, %v364_v28 }
  0x14   : > { %v776_v5 = vpack.i.bf16 %v901_v4, %v897_v3  ;;  %v350_v48 = vsub.s32 3, %v939_v12  ;;  %vm382_vm4 = vcmp.lt.s32.totalorder %v941_v13, 127  ;;  %v1010_v53 = vrot.slane %v948_v16, %v364_v28 }
  0x15   : > { %vm345_vm5 = vcmp.lt.s32.totalorder %v941_v13, 1  ;;  %v371_v58 = vmul.f32 %v998_v44, %v901_v4  ;;  %v1022_v59 = vmul.f32 0.0, %v998_v44  ;;  %v327_v63 = vsub.s32 2, %v939_v12 }
  0x16   : > { %777 = vrot.lane.b32.xlu0 %v776_v5, %s829_s28  ;;  %782 = vrot.lane.b32.xlu1 %v776_v5, %s830_s29  ;;  %v1029_v62 = vrot.slane %v953_v17, %v350_v48  ;;  %v370_v10 = vmul.f32 %v1010_v53, %v897_v3  ;;  %v1038_v15 = vrot.slane %v948_v16, %v350_v48  ;;  %vm322_vm6 = vcmp.lt.s32.totalorder %v941_v13, 15 }
  0x17   : > { %v1055_v28 = vrot.slane %v953_v17, %v327_v63  ;;  %vm299_vm7 = vcmp.lt.s32.totalorder %v941_v13, 16  ;;  %vm276_vm8 = vcmp.lt.s32.totalorder %v941_v13, 17  ;;  %vm451_vm9 = vcmp.lt.s32.totalorder %v941_v13, 111 }
  0x1a   : > { %424 = vrot.lane.b32.xlu0 %v831_v6, %s829_s28  ;;  %401 = vrot.lane.b32.xlu1 %v831_v6, %s830_s29 }
  0x1e   : > { %787 = vrot.lane.b32.xlu0 %v776_v5, %s832_s30  ;;  %378 = vrot.lane.b32.xlu1 %v831_v6, %s832_s30 }
  0x22   : > { %792 = vrot.lane.b32.xlu0 %v776_v5, %s833_s7  ;;  %341 = vrot.lane.b32.xlu1 %v831_v6, %s833_s7 }
  0x26   : > { %797 = vrot.lane.b32.xlu0 %v776_v5, %s834_s8  ;;  %318 = vrot.lane.b32.xlu1 %v831_v6, %s834_s8 }
  0x2a   : > { %802 = vrot.lane.b32.xlu0 %v776_v5, %s835_s9  ;;  %295 = vrot.lane.b32.xlu1 %v831_v6, %s835_s9 }
  0x2e   : > { %807 = vrot.lane.b32.xlu0 %v776_v5, %s836_s10  ;;  %270 = vrot.lane.b32.xlu1 %v831_v6, %s836_s10 }
  0x32   : > { %812 = vrot.lane.b32.xlu0 %v776_v5, %s837_s13  ;;  %447 = vrot.lane.b32.xlu1 %v831_v6, %s837_s13 }
  0x36   : > { %472 = vperm.xlu0 %816, %v469_v9  }
  0x88   : > { %v778_v18 = vpop.permute.xlu0 %777  ;;  %v783_v19 = vpop.permute.xlu1 %782 }
  0x89   : > { %v780_v23 = vunpack.i.h.bf16 %v778_v18  ;;  %v779_v24 = vunpack.i.l.bf16 %v778_v18  ;;  %v785_v25 = vunpack.i.h.bf16 %v783_v19  ;;  %v784_v26 = vunpack.i.l.bf16 %v783_v19 }
  0x8a   : > { %v1041_v18 = vmul.f32 0.0, %v1010_v53 }
  0x8b   : > { %v407_v29 = vsel %vm405_vm2, %v785_v25, %v784_v26  ;;  %v430_v30 = vsel %vm428_vm3, %v780_v23, %v779_v24  ;;  %v429_v31 = vsel %vm428_vm3, %v779_v24, %v780_v23  ;;  %v406_v38 = vsel %vm405_vm2, %v784_v26, %v785_v25 }
  0x8c   : > { %v425_v32 = vpop.permute.xlu0 %424  ;;  %v402_v34 = vpop.permute.xlu1 %401  ;;  %v417_v35 = vmul.f32 %v963_v22, %v407_v29  ;;  %v440_v36 = vmul.f32 %v960_v21, %v430_v30  ;;  %v439_v37 = vmul.f32 %v957_v20, %v429_v31  ;;  %v416_v49 = vmul.f32 %v975_v33, %v406_v38 }
  0x8d   : > { %v983_v39 = vmul.f32 %v957_v20, %v425_v32  ;;  %v986_v40 = vmul.f32 %v960_v21, %v425_v32  ;;  %v989_v41 = vmul.f32 %v963_v22, %v402_v34  ;;  %v1006_v50 = vmul.f32 %v975_v33, %v402_v34 }
  0x8e   : > { %v375_v24 = vpack.c.bf16 %v1022_v59, %v371_v58  ;;  %v304_v25 = vsub.s32 1, %v939_v12 }
  0x8f   : > { %v421_v45 = vpack.c.bf16 %v989_v41, %v417_v35  ;;  %v444_v46 = vpack.c.bf16 %v986_v40, %v440_v36  ;;  %v443_v47 = vpack.c.bf16 %v983_v39, %v439_v37  ;;  %v420_v0 = vpack.c.bf16 %v1006_v50, %v416_v49 }
  0x90   : > { %v788_v51 = vpop.permute.xlu0 %787  ;;  %v379_v52 = vpop.permute.xlu1 %378  ;;  %v374_v35 = vpack.c.bf16 %v1041_v18, %v370_v10  ;;  %v1061_v36 = vrot.slane %v948_v16, %v327_v63 }
  0x91   : > { %v790_v54 = vunpack.i.h.bf16 %v788_v51  ;;  %v789_v55 = vunpack.i.l.bf16 %v788_v51  ;;  %485 = vmatprep.subr.bf16.mxu0 %v444_v46  ;;  %v1014_v56 = vmul.f32 %v992_v42, %v379_v52  ;;  %v1017_v57 = vmul.f32 %v995_v43, %v379_v52 }
  0x92   : > { %486 = vmatpush1.bf16.msra.mxu0 %v443_v47  ;;  %v281_v46 = vsub.s32 0, %v939_v12 }
  0x93   : > { %v383_v60 = vsel %vm382_vm4, %v789_v55, %v790_v54  ;;  %v384_v61 = vsel %vm382_vm4, %v790_v54, %v789_v55  ;;  %487 = vmatprep.subr.bf16.mxu0 %v421_v45  ;;  %v1068_v45 = vrot.slane %v953_v17, %v304_v25 }
  0x94   : > { %v393_v5 = vmul.f32 %v992_v42, %v383_v60  ;;  %v394_v4 = vmul.f32 %v995_v43, %v384_v61  ;;  %v793_v8 = vpop.permute.xlu0 %792  ;;  %v342_v9 = vpop.permute.xlu1 %341  ;;  %v1082_v60 = vrot.slane %v948_v16, %v304_v25 }
  0x95   : > { %v795_v11 = vunpack.i.h.bf16 %v793_v8  ;;  %v794_v14 = vunpack.i.l.bf16 %v793_v8  ;;  %v1052_v27 = vmul.f32 %v1029_v62, %v342_v9  ;;  %v1065_v38 = vmul.f32 %v1038_v15, %v342_v9 }
  0x96   : > { %v397_v19 = vpack.c.bf16 %v1014_v56, %v393_v5  ;;  %v398_v23 = vpack.c.bf16 %v1017_v57, %v394_v4  ;;  %488 = vmatpush1.bf16.msra.mxu0 %v420_v0  ;;  %v1090_v5 = vrot.slane %v953_v17, %v281_v46 }
  0x97   : > { %v346_v3 = vsel %vm345_vm5, %v794_v14, %v795_v11  ;;  %v347_v26 = vsel %vm345_vm5, %v795_v11, %v794_v14 }
  0x98   : > { %489 = vmatprep.subr.bf16.mxu0 %v398_v23  ;;  %v357_v29 = vmul.f32 %v1029_v62, %v346_v3  ;;  %v798_v30 = vpop.permute.xlu0 %797  ;;  %v319_v31 = vpop.permute.xlu1 %318  ;;  %v356_v37 = vmul.f32 %v1038_v15, %v347_v26  ;;  %v1108_v26 = vrot.slane %v948_v16, %v281_v46  ;;  %v1123_v16 = vld [vmem:[%s1262_s1 + $0x18] ss:$0 sm:$0xff] }
  0x99   : > { %v800_v32 = vunpack.i.h.bf16 %v798_v30  ;;  %v799_v34 = vunpack.i.l.bf16 %v798_v30  ;;  %v1077_v51 = vmul.f32 %v1055_v28, %v319_v31  ;;  %v1087_v0 = vmul.f32 %v1061_v36, %v319_v31 }
  0x9a   : > { %490 = vmatpush1.bf16.msra.mxu0 %v397_v19  ;;  %v361_v47 = vpack.c.bf16 %v1052_v27, %v357_v29  ;;  %v360_v61 = vpack.c.bf16 %v1065_v38, %v356_v37 }
  0x9b   : > { %v323_v48 = vsel %vm322_vm6, %v799_v34, %v800_v32  ;;  %v324_v49 = vsel %vm322_vm6, %v800_v32, %v799_v34  ;;  %491 = vmatprep.subr.bf16.mxu0 %v375_v24 }
  0x9c   : > { %v334_v52 = vmul.f32 %v1055_v28, %v323_v48  ;;  %v803_v54 = vpop.permute.xlu0 %802  ;;  %v296_v55 = vpop.permute.xlu1 %295  ;;  %v333_v63 = vmul.f32 %v1061_v36, %v324_v49 }
  0x9d   : > { %v805_v58 = vunpack.i.h.bf16 %v803_v54  ;;  %v804_v12 = vunpack.i.l.bf16 %v803_v54  ;;  %v1098_v10 = vmul.f32 %v1068_v45, %v296_v55  ;;  %v1105_v3 = vmul.f32 %v1082_v60, %v296_v55 }
  0x9e   : > { %492 = vmatpush1.bf16.msra.mxu0 %v374_v35  ;;  %v338_v4 = vpack.c.bf16 %v1077_v51, %v334_v52  ;;  %v337_v24 = vpack.c.bf16 %v1087_v0, %v333_v63 }
  0x9f   : > { %v300_v8 = vsel %vm299_vm7, %v804_v12, %v805_v58  ;;  %v301_v9 = vsel %vm299_vm7, %v805_v58, %v804_v12  ;;  %493 = vmatprep.subr.bf16.mxu0 %v361_v47  ;;  %v1138_v12 = vld [vmem:[%s1262_s1 + $0x10] ss:$0 sm:$0xff] }
  0xa0   : > { %v311_v11 = vmul.f32 %v1068_v45, %v300_v8  ;;  %v808_v14 = vpop.permute.xlu0 %807  ;;  %v271_v19 = vpop.permute.xlu1 %270  ;;  %v310_v25 = vmul.f32 %v1082_v60, %v301_v9 }
  0xa1   : > { %v810_v17 = vunpack.i.h.bf16 %v808_v14  ;;  %v809_v23 = vunpack.i.l.bf16 %v808_v14  ;;  %v1116_v32 = vmul.f32 %v1090_v5, %v271_v19  ;;  %v1128_v52 = vmul.f32 %v1108_v26, %v271_v19 }
  0xa2   : > { %494 = vmatpush1.bf16.msra.mxu0 %v360_v61  ;;  %v315_v29 = vpack.c.bf16 %v1098_v10, %v311_v11  ;;  %v314_v48 = vpack.c.bf16 %v1105_v3, %v310_v25  ;;  %v743_v19 = vcombine.low %v929_v7, %v929_v7  ;;  %v615_v7 = vld [vmem:[%s1266_s5] sm:$0xff] }
  0xa3   : > { %v277_v30 = vsel %vm276_vm8, %v809_v23, %v810_v17  ;;  %v278_v31 = vsel %vm276_vm8, %v810_v17, %v809_v23  ;;  %495 = vmatprep.subr.bf16.mxu0 %v338_v4 }
  0xa4   : > { %v288_v34 = vmul.f32 %v1090_v5, %v277_v30  ;;  %v813_v35 = vpop.permute.xlu0 %812  ;;  %v448_v37 = vpop.permute.xlu1 %447  ;;  %v287_v49 = vmul.f32 %v1108_v26, %v278_v31 }
  0xa5   : > { %v815_v46 = vunpack.i.h.bf16 %v813_v35  ;;  %v814_v47 = vunpack.i.l.bf16 %v813_v35  ;;  %v1141_v61 = vmul.f32 %v1123_v16, %v448_v37  ;;  %v1147_v9 = vmul.f32 %v1138_v12, %v448_v37  ;;  %v1175_v37 = vld [vmem:[%s1265_s4] sm:$0xff] }
  0xa6   : > { %496 = vmatpush1.bf16.msra.mxu0 %v337_v24  ;;  %v292_v54 = vpack.c.bf16 %v1116_v32, %v288_v34  ;;  %v291_v4 = vpack.c.bf16 %v1128_v52, %v287_v49 }
  0xa7   : > { %v452_v55 = vsel %vm451_vm9, %v814_v47, %v815_v46  ;;  %v453_v58 = vsel %vm451_vm9, %v815_v46, %v814_v47  ;;  %497 = vmatprep.subr.bf16.mxu0 %v315_v29  ;;  %v747_v46 = vcombine.high %v1175_v37, %v1175_v37 }
  0xa8   : > { %v463_v63 = vmul.f32 %v1123_v16, %v453_v58  ;;  %v462_v8 = vmul.f32 %v1138_v12, %v452_v55 }
  0xa9   : > { %754 = vmatprep.mubr.msk.bf16.mxu1 %vm627_vm10, %v747_v46 }
  0xaa   : > { %498 = vmatpush1.bf16.msra.mxu0 %v314_v48  ;;  %v467_v11 = vpack.c.bf16 %v1141_v61, %v463_v63  ;;  %v466_v14 = vpack.c.bf16 %v1147_v9, %v462_v8 }
  0xab   : > { %499 = vmatprep.subr.bf16.mxu0 %v292_v54 }
  0xae   : > { %500 = vmatpush1.bf16.msra.mxu0 %v291_v4 }
  0xaf   : > { %515 = vmatprep.subr.bf16.mxu0 %v467_v11 }
  0xb1   : > { %v473_v17 = vpop.permute.xlu0 %472 }
  0xb2   : > { %516 = vmatpush2.bf16.msra.mxu0 %v466_v14 }
  0xb5   : > { %518 = vmatmul.mubr.bf16.vlgmr.msra.gmra.mxu0 %v743_v19 }
 0x175   : > { %v519_v23 = vpop.f32.mrf.mxu0 }
 0x176   : > { %v520_v24 = vadd.f32 %v519_v23, %v473_v17 }
 0x177   : > { %v521_v25 = vpop.f32.mrf.mxu0 }
 0x178   : > { %v526_v29 = vmax.f32 %v520_v24, 0.0  ;;  %v522_v30 = vadd.f32 %v521_v25, %v473_v17 }
 0x179   : > { %v523_v31 = vpop.f32.mrf.mxu0 }
 0x17a   : > { %582 = vrot.lane.b32.xlu0 %v526_v29, %s830_s29  ;;  %592 = vrot.lane.b32.xlu1 %v526_v29, %s829_s28  ;;  %v527_v35 = vmax.f32 %v522_v30, 0.0 }
 0x17b   : > { %v524_v34 = vpop.f32.mrf.mxu0 }
 0x17e   : > { %572 = vrot.lane.b32.xlu0 %v526_v29, %s832_s30  ;;  %594 = vrot.lane.b32.xlu1 %v527_v35, %s829_s28 }
 0x182   : > { %558 = vrot.lane.b32.xlu0 %v526_v29, %s833_s7  ;;  %584 = vrot.lane.b32.xlu1 %v527_v35, %s830_s29 }
 0x186   : > { %548 = vrot.lane.b32.xlu0 %v526_v29, %s834_s8  ;;  %574 = vrot.lane.b32.xlu1 %v527_v35, %s832_s30  ;;  %s740_s30 = sshll.u32 %s1269_s23, 3 }
 0x18a   : > { %538 = vrot.lane.b32.xlu0 %v526_v29, %s835_s9  ;;  %560 = vrot.lane.b32.xlu1 %v527_v35, %s833_s7 }
 0x18e   : > { %528 = vrot.lane.b32.xlu0 %v526_v29, %s836_s10  ;;  %550 = vrot.lane.b32.xlu1 %v527_v35, %s834_s8 }
 0x192   : > { %602 = vrot.lane.b32.xlu0 %v526_v29, %s837_s13  ;;  %540 = vrot.lane.b32.xlu1 %v527_v35, %s835_s9  ;;  %s253_s9 = scalar_lea.vmem %s1267_s6, %s740_s30 }
 0x196   : > { %618 = vperm.xlu0 %816, %v615_v7   ;;  %530 = vrot.lane.b32.xlu1 %v527_v35, %s836_s10 }
 0x19a   : > { %604 = vrot.lane.b32.xlu1 %v527_v35, %s837_s13 }
 0x1ec   : > { %v583_v47 = vpop.permute.xlu0 %582  ;;  %v593_v48 = vpop.permute.xlu1 %592 }
 0x1f0   : > { %v573_v49 = vpop.permute.xlu0 %572  ;;  %v595_v54 = vpop.permute.xlu1 %594 }
 0x1f1   : > { %v596_v55 = vsel %vm428_vm3, %v593_v48, %v595_v54  ;;  %v597_v58 = vsel %vm428_vm3, %v595_v54, %v593_v48 }
 0x1f2   : > { %v598_v63 = vmul.f32 %v596_v55, %v957_v20  ;;  %v599_v4 = vmul.f32 %v597_v58, %v960_v21 }
 0x1f4   : > { %v585_v8 = vpop.permute.xlu1 %584  ;;  %v601_v11 = vpack.c.bf16 %v986_v40, %v599_v4  ;;  %v600_v14 = vpack.c.bf16 %v983_v39, %v598_v63  ;;  %v559_v23 = vpop.permute.xlu0 %558 }
 0x1f5   : > { %v586_v19 = vsel %vm405_vm2, %v583_v47, %v585_v8  ;;  %v587_v17 = vsel %vm405_vm2, %v585_v8, %v583_v47  ;;  %v568_v47 = vmul.f32 %v526_v29, %v1010_v53 }
 0x1f6   : > { %v588_v24 = vmul.f32 %v586_v19, %v975_v33  ;;  %v589_v25 = vmul.f32 %v587_v17, %v963_v22  ;;  %631 = vmatprep.subr.bf16.mxu1 %v601_v11  ;;  %v569_v22 = vmul.f32 %v527_v35, %v998_v44 }
 0x1f7   : > { %632 = vmatpush1.bf16.msra.mxu1 %v600_v14  ;;  %v570_v48 = vpack.c.bf16 %v1041_v18, %v568_v47 }
 0x1f8   : > { %v575_v20 = vpop.permute.xlu1 %574  ;;  %v591_v21 = vpack.c.bf16 %v989_v41, %v589_v25  ;;  %v590_v40 = vpack.c.bf16 %v1006_v50, %v588_v24  ;;  %v549_v33 = vpop.permute.xlu0 %548  ;;  %v571_v44 = vpack.c.bf16 %v1022_v59, %v569_v22  ;;  %v746_v24 = vcombine.low %v1175_v37, %v1175_v37 }
 0x1f9   : > { %v576_v39 = vsel %vm382_vm4, %v573_v49, %v575_v20  ;;  %v577_v30 = vsel %vm382_vm4, %v575_v20, %v573_v49 }
 0x1fa   : > { %v578_v31 = vmul.f32 %v576_v39, %v992_v42  ;;  %v579_v34 = vmul.f32 %v577_v30, %v995_v43  ;;  %633 = vmatprep.subr.bf16.mxu1 %v591_v21 }
 0x1fb   : > { %634 = vmatpush1.bf16.msra.mxu1 %v590_v40 }
 0x1fc   : > { %v561_v7 = vpop.permute.xlu1 %560  ;;  %v581_v41 = vpack.c.bf16 %v1017_v57, %v579_v34  ;;  %v580_v50 = vpack.c.bf16 %v1014_v56, %v578_v31  ;;  %v539_v49 = vpop.permute.xlu0 %538 }
 0x1fd   : > { %v562_v46 = vsel %vm345_vm5, %v559_v23, %v561_v7  ;;  %v563_v42 = vsel %vm345_vm5, %v561_v7, %v559_v23 }
 0x1fe   : > { %v565_v43 = vmul.f32 %v562_v46, %v1029_v62  ;;  %635 = vmatprep.subr.bf16.mxu1 %v581_v41  ;;  %v564_v57 = vmul.f32 %v563_v42, %v1038_v15 }
 0x1ff   : > { %636 = vmatpush1.bf16.msra.mxu1 %v580_v50 }
 0x200   : > { %637 = vmatprep.subr.bf16.mxu1 %v571_v44  ;;  %v551_v35 = vpop.permute.xlu1 %550  ;;  %v567_v62 = vpack.c.bf16 %v1052_v27, %v565_v43  ;;  %v566_v55 = vpack.c.bf16 %v1065_v38, %v564_v57 }
 0x201   : > { %v552_v56 = vsel %vm322_vm6, %v549_v33, %v551_v35  ;;  %v553_v53 = vsel %vm322_vm6, %v551_v35, %v549_v33 }
 0x202   : > { %v555_v29 = vmul.f32 %v552_v56, %v1055_v28  ;;  %v554_v54 = vmul.f32 %v553_v53, %v1061_v36  ;;  %v529_v28 = vpop.permute.xlu0 %528 }
 0x203   : > { %638 = vmatpush1.bf16.msra.mxu1 %v570_v48 }
 0x204   : > { %v541_v59 = vpop.permute.xlu1 %540  ;;  %639 = vmatprep.subr.bf16.mxu1 %v567_v62  ;;  %v557_v63 = vpack.c.bf16 %v1077_v51, %v555_v29  ;;  %v556_v8 = vpack.c.bf16 %v1087_v0, %v554_v54 }
 0x205   : > { %v542_v15 = vsel %vm299_vm7, %v539_v49, %v541_v59  ;;  %v543_v18 = vsel %vm299_vm7, %v541_v59, %v539_v49 }
 0x206   : > { %v545_v58 = vmul.f32 %v542_v15, %v1068_v45  ;;  %v544_v4 = vmul.f32 %v543_v18, %v1082_v60  ;;  %v603_v60 = vpop.permute.xlu0 %602 }
 0x207   : > { %640 = vmatpush1.bf16.msra.mxu1 %v566_v55 }
 0x208   : > { %v531_v27 = vpop.permute.xlu1 %530  ;;  %641 = vmatprep.subr.bf16.mxu1 %v557_v63  ;;  %v547_v45 = vpack.c.bf16 %v1098_v10, %v545_v58  ;;  %v546_v19 = vpack.c.bf16 %v1105_v3, %v544_v4 }
 0x209   : > { %v532_v36 = vsel %vm276_vm8, %v529_v28, %v531_v27  ;;  %v533_v38 = vsel %vm276_vm8, %v531_v27, %v529_v28 }
 0x20a   : > { %v535_v11 = vmul.f32 %v532_v36, %v1090_v5  ;;  %v534_v14 = vmul.f32 %v533_v38, %v1108_v26  ;;  %v749_v5 = vpack.c.bf16 %v831_v6, %v893_v2 }
 0x20b   : > { %642 = vmatpush1.bf16.msra.mxu1 %v556_v8 }
 0x20c   : > { %v605_v51 = vpop.permute.xlu1 %604  ;;  %643 = vmatprep.subr.bf16.mxu1 %v547_v45  ;;  %v537_v17 = vpack.c.bf16 %v1116_v32, %v535_v11  ;;  %v536_v10 = vpack.c.bf16 %v1128_v52, %v534_v14  ;;  %v752_v32 = vpack.c.bf16 %v831_v6, %v889_v1 }
 0x20d   : > { %v607_v0 = vsel %vm451_vm9, %v605_v51, %v603_v60  ;;  %v606_v3 = vsel %vm451_vm9, %v603_v60, %v605_v51 }
 0x20e   : > { %v609_v26 = vmul.f32 %v1123_v16, %v607_v0  ;;  %v608_v23 = vmul.f32 %v1138_v12, %v606_v3 }
 0x20f   : > { %644 = vmatpush1.bf16.msra.mxu1 %v546_v19 }
 0x210   : > { %645 = vmatprep.subr.bf16.mxu1 %v537_v17  ;;  %v611_v2 = vpack.c.bf16 %v1141_v61, %v609_v26  ;;  %v610_v52 = vpack.c.bf16 %v1147_v9, %v608_v23 }
 0x211   : > { %v619_v13 = vpop.permute.xlu0 %618 }
 0x213   : > { %646 = vmatpush1.bf16.msra.mxu1 %v536_v10 }
 0x214   : > { %750 = vmatprep.subr.msk.bf16.mxu1 %vm748_vm12, %v749_v5 }
 0x217   : > { %753 = vmatpush2.bf16.msk.msra.mxu1 %vm748_vm12, %v752_v32 }
 0x218   : > { %661 = vmatprep.subr.bf16.mxu1 %v611_v2 }
 0x21b   : > { %662 = vmatpush2.bf16.msra.mxu1 %v610_v52 }
 0x21e   : > { %664 = vmatmul.mubr.bf16.vlgmr.msra.gmra.mxu1 %v746_v24 }
 0x2de   : > { %v665_v16 = vpop.f32.mrf.mxu1 }
 0x2df   : > { %v666_v25 = vadd.f32 %v665_v16, %v619_v13 }
 0x2e0   : > { %v667_v1 = vpop.f32.mrf.mxu1 }
 0x2e1   : > { %v672_v6 = vmax.f32 %v666_v25, 0.0  ;;  %v668_v12 = vadd.f32 %v667_v1, %v619_v13 }
 0x2e2   : > { %v669_v61 = vpop.f32.mrf.mxu1 }
 0x2e3   : > { %674 = vst [vmem:[%s253_s9] sm:$0xff] %v672_v6  ;;  %v673_v20 = vmax.f32 %v668_v12, 0.0 }
 0x2e4   : > { %v670_v9 = vpop.f32.mrf.mxu1 }
 0x2e5   : > { %675 = vst [vmem:[%s253_s9 + $0x8] sm:$0xff] %v673_v20 }
 0x2e6 PF: > { %s16_s21 = sadd.s32 1, %s827_s21  }
 0x2e7   : > { %p13_p4 = scmp.ge.s32.totalorder %s16_s21, 4  }
 0x2e9   :  { %15 = sbr.rel (!%p13_p4) target bundleno = 1 (0x1), region = 74 }

</bundles_post_ra>
